<compile_context>
chip_gen: v7x
topology: tpu7x:2x2x1
jax: 0.10.0
libtpu: 0.0.40
codegen_flags: <defaults>
</compile_context>

<pallas_src>
import functools

import jax
import jax.numpy as jnp
from jax.experimental import pallas as pl
from jax.experimental.pallas import tpu as pltpu

_LANES = 128
_CHUNK_ROWS = 256          # inner-loop chunk: (256,128) f32 = 32 vregs / intermediate
_DEFAULT_BLOCK_ROWS = 4096 # 2 MiB per f32 input block (safe on v5e/v7x defaults)
_V6_BLOCK_ROWS = 8192      # 4 MiB per block on v6e (fewer grid steps, still < 32 MiB scoped)


def _round_up(a, b):
    return (a + b - 1) // b * b


def _cdiv(a, b):
    return -(-a // b)


def _pick_block_rows():
    try:
        kind = jax.devices()[0].device_kind.lower()
    except Exception:  # pragma: no cover - device query should not be fatal
        kind = ""
    return _V6_BLOCK_ROWS if "v6" in kind else _DEFAULT_BLOCK_ROWS


def _vfl_partial_sum_kernel(pred_ref, target_ref, out_ref, *, alpha, gamma,
                            iou_weighted, square_gamma, chunk_rows,
                            n_valid_elems, need_mask):
    """One grid step: sums the elementwise varifocal loss of its
    (block_rows, 128) window into a private (8, 128) output block.

    The work is chunked (chunk_rows, 128) at a time so every intermediate of
    the elementwise chain stays in vregs; the running sum is a local (8, 128)
    f32 accumulator carried through the loop and stored to out_ref once.
    """
    block_rows = pred_ref.shape[0]
    n_chunks = block_rows // chunk_rows
    block_row0 = pl.program_id(0) * block_rows  # global row offset of this block

    if need_mask:
        # Loop-invariant lane index (JAX does not CSE broadcast_in_dim in loops).
        lane_iota = jax.lax.broadcasted_iota(jnp.int32, (1, _LANES), 1)

    def chunk_body(j, acc):
        start = j * chunk_rows
        if not isinstance(start, int):
            start = pl.multiple_of(start, chunk_rows)
        x = pred_ref[pl.ds(start, chunk_rows), :].astype(jnp.float32)
        t = target_ref[pl.ds(start, chunk_rows), :].astype(jnp.float32)

        s = jax.nn.sigmoid(x)
        d = jnp.abs(s - t)
        # gamma == 2: one VPU mul instead of an exp/log pow on the single EUP.
        d_pow = d * d if square_gamma else jnp.power(d, gamma)
        # t > 0  -> positive example: weight = t (iou_weighted) or 1
        # t <= 0 -> negative example: weight = alpha * |sigmoid(x) - t|^gamma
        if iou_weighted:
            fw = jnp.where(t > 0.0, t, alpha * d_pow)
        else:
            fw = jnp.where(t > 0.0, 1.0, alpha * d_pow)
        # BCE-with-logits(x,t) = max(x,0) - x*t + log1p(exp(-|x|)) and
        # log1p(exp(-|x|)) == -log(max(sigmoid(x), 1 - sigmoid(x)))   (reuses s;
        # 2 EUP transcendentals/elem instead of 3; ~1e-7 abs error for |x|>8,
        # fine for a summed/mean loss — do NOT reuse for reduction='none').
        bce = jnp.maximum(x, 0.0) - x * t - jnp.log(jnp.maximum(s, 1.0 - s))
        loss = bce * fw

        if need_mask:
            # Zero out elements whose flat index >= n_valid_elems.  Covers both
            # the (<1024-elem) wrapper zero-pad and the unspecified data Pallas
            # reads for a ragged last block.  jnp.where (not a multiply) so NaN
            # from garbage rows cannot propagate.
            row_idx = (block_row0 + start) + jax.lax.broadcasted_iota(
                jnp.int32, (chunk_rows, 1), 0)
            lanes_valid = n_valid_elems - row_idx * _LANES   # (chunk_rows, 1)
            loss = jnp.where(lane_iota < lanes_valid, loss, 0.0)

        # (chunk_rows,128) -> (chunk_rows//8, 8, 128): tile-aligned, free relayout;
        # the reduce over the leading axis is pure VPU adds (no XLU).
        return acc + loss.reshape(chunk_rows // 8, 8, _LANES).sum(axis=0)

    acc0 = jnp.zeros((8, _LANES), jnp.float32)
    if n_chunks == 1:
        acc = chunk_body(0, acc0)
    else:
        acc = jax.lax.fori_loop(0, n_chunks, chunk_body, acc0)
    out_ref[...] = acc


def varifocal_loss_pallas(pred, target, weight=None, *, alpha=0.75, gamma=2.0,
                          iou_weighted=True, reduction='mean',
                          loss_weight=1.0, avg_factor=None):
    """Pallas implementation of VarifocalLoss.forward (use_sigmoid=True)."""
    assert pred.shape == target.shape
    if weight is not None:
        raise NotImplementedError("per-element weight not supported")
        # TODO(synk): pass `weight` as a third lane-dense operand and multiply.
    if reduction == 'none':
        raise NotImplementedError(
            "reduction='none' needs the elementwise (N, C) loss")
        # TODO(synk): add a kernel variant that writes the (N, C) loss map
        # (use the accurate log1p(exp(-|x|)) form there).

    n_elems = 1
    for dim in pred.shape:
        n_elems *= dim
    if n_elems == 0:
        return jnp.float32(0.0)  # avoid 0/0 in the 'mean' path

    pred_flat = pred.reshape(-1)
    target_flat = target.reshape(-1)

    # Only pad up to a multiple of 8*128 = 1024 elements (and only if needed);
    # padded values are irrelevant because the kernel masks by n_elems.
    padded = _round_up(n_elems, 8 * _LANES)
    if padded != n_elems:
        pred_flat = jnp.pad(pred_flat, (0, padded - n_elems))
        target_flat = jnp.pad(target_flat, (0, padded - n_elems))
    rows = padded // _LANES                       # multiple of 8
    pred2d = pred_flat.reshape(rows, _LANES)      # free reshape (row-major)
    target2d = target_flat.reshape(rows, _LANES)

    if rows <= _CHUNK_ROWS:
        block_rows = rows
        chunk_rows = rows
    else:
        chunk_rows = _CHUNK_ROWS
        block_rows = min(_pick_block_rows(), (rows // _CHUNK_ROWS) * _CHUNK_ROWS)
    num_blocks = _cdiv(rows, block_rows)
    # Mask only when the grid coverage (incl. ragged last block / tiny pad)
    # exceeds the real element count; the common aligned case compiles mask-free.
    need_mask = (num_blocks * block_rows * _LANES) != n_elems

    kernel = functools.partial(
        _vfl_partial_sum_kernel,
        alpha=float(alpha), gamma=float(gamma),
        iou_weighted=bool(iou_weighted),
        square_gamma=(float(gamma) == 2.0),
        chunk_rows=chunk_rows,
        n_valid_elems=int(n_elems),
        need_mask=bool(need_mask))

    partials = pl.pallas_call(
        kernel,
        out_shape=jax.ShapeDtypeStruct((num_blocks * 8, _LANES), jnp.float32),
        grid_spec=pltpu.PrefetchScalarGridSpec(
            num_scalar_prefetch=0,
            grid=(num_blocks,),
            in_specs=[
                pl.BlockSpec((block_rows, _LANES), lambda i: (i, 0)),
                pl.BlockSpec((block_rows, _LANES), lambda i: (i, 0)),
            ],
            out_specs=pl.BlockSpec((8, _LANES), lambda i: (i, 0)),
        ),
        compiler_params=pltpu.CompilerParams(
            dimension_semantics=("parallel",)),
    )(pred2d, target2d)

    s = jnp.sum(partials)

    if avg_factor is None:
        if reduction == 'mean':
            loss = s / jnp.float32(n_elems)
        elif reduction == 'sum':
            loss = s
        else:
            raise ValueError(f"unknown reduction {reduction!r}")
    elif reduction == 'mean':
        eps = jnp.finfo(jnp.float32).eps
        loss = s / (jnp.float32(avg_factor) + eps)
    else:
        raise ValueError('avg_factor can not be used with reduction="sum"')

    return jnp.float32(loss_weight) * loss


def _varifocal_loss_ref(pred, target, alpha=0.75, gamma=2.0, iou_weighted=True,
                        reduction='mean', loss_weight=1.0):
    pred_sigmoid = jax.nn.sigmoid(pred)
    pos = (target > 0.0).astype(jnp.float32)
    neg = (target <= 0.0).astype(jnp.float32)
    if iou_weighted:
        fw = target * pos + alpha * jnp.abs(pred_sigmoid - target) ** gamma * neg
    else:
        fw = pos + alpha * jnp.abs(pred_sigmoid - target) ** gamma * neg
    bce = jnp.maximum(pred, 0.0) - pred * target + jnp.log1p(jnp.exp(-jnp.abs(pred)))
    loss = bce * fw
    if reduction == 'mean':
        return loss_weight * jnp.mean(loss)
    return loss_weight * jnp.sum(loss)


if __name__ == "__main__":
    key = jax.random.PRNGKey(0)
    k1, k2, k3 = jax.random.split(key, 3)

    # (num predictions, num classes) — lane-aligned case (mask-free kernel).
    N, C = 256, 80
    pred = jax.random.normal(k1, (N, C), dtype=jnp.float32) * 2.0
    iou = jax.random.uniform(k2, (N, C), dtype=jnp.float32)
    pos_mask = jax.random.uniform(k3, (N, C)) < 0.05
    target = jnp.where(pos_mask, iou, 0.0).astype(jnp.float32)

    loss_mean = jax.block_until_ready(
        varifocal_loss_pallas(pred, target, alpha=0.75, gamma=2.0,
                              iou_weighted=True, reduction='mean',
                              loss_weight=1.0))
    ref_mean = _varifocal_loss_ref(pred, target, reduction='mean')
    assert jnp.allclose(loss_mean, ref_mean, rtol=1e-4, atol=1e-5), (loss_mean, ref_mean)

    loss_sum = jax.block_until_ready(
        varifocal_loss_pallas(pred, target, reduction='sum'))
    ref_sum = _varifocal_loss_ref(pred, target, reduction='sum')
    assert jnp.allclose(loss_sum, ref_sum, rtol=1e-4, atol=1e-3), (loss_sum, ref_sum)

    # Ragged shape -> exercises the in-kernel tail mask.
    Nr, Cr = 37, 7
    pred_r = jax.random.normal(k1, (Nr, Cr), dtype=jnp.float32)
    targ_r = jnp.where(jax.random.uniform(k2, (Nr, Cr)) < 0.1,
                       jax.random.uniform(k3, (Nr, Cr)), 0.0).astype(jnp.float32)
    lr = jax.block_until_ready(varifocal_loss_pallas(pred_r, targ_r, reduction='mean'))
    rr = _varifocal_loss_ref(pred_r, targ_r, reduction='mean')
    assert jnp.allclose(lr, rr, rtol=1e-4, atol=1e-5), (lr, rr)

    # Multi-block + multi-chunk inner loop + ragged last block.
    Nb, Cb = 1024, 80
    pred_b = jax.random.normal(k2, (Nb, Cb), dtype=jnp.float32) * 2.0
    targ_b = jnp.where(jax.random.uniform(k1, (Nb, Cb)) < 0.05,
                       jax.random.uniform(k3, (Nb, Cb)), 0.0).astype(jnp.float32)
    lb = jax.block_until_ready(varifocal_loss_pallas(pred_b, targ_b, reduction='mean'))
    rb = _varifocal_loss_ref(pred_b, targ_b, reduction='mean')
    assert jnp.allclose(lb, rb, rtol=1e-4, atol=1e-5), (lb, rb)

    print("KERNEL_OK")
</pallas_src>

<mosaic_0001>
module attributes {stable_mosaic.version = 11 : i64} {
  func.func @_vfl_partial_sum_kernel(%arg0: i32, %arg1: memref<160x128xf32, #tpu.memory_space<vmem>>, %arg2: memref<160x128xf32, #tpu.memory_space<vmem>>, %arg3: memref<8x128xf32, #tpu.memory_space<vmem>>) attributes {dimension_semantics = [#tpu.dimension_semantics<parallel>], iteration_bounds = array<i64: 1>, scalar_prefetch = 0 : i64, scratch_operands = 0 : i64, tpu.core_type = #tpu.core_type<tc>, window_params = [{transform_indices = @transform_0, window_bounds = array<i64: 160, 128>}, {transform_indices = @transform_1, window_bounds = array<i64: 160, 128>}, {transform_indices = @transform_2, window_bounds = array<i64: 8, 128>}]} {
    %cst = arith.constant 0.000000e+00 : f32
    %0 = vector.broadcast %cst : f32 to vector<8x128xf32>
    %c0 = arith.constant 0 : index
    %c0_0 = arith.constant 0 : index
    %1 = vector.load %arg1[%c0, %c0_0] : memref<160x128xf32, #tpu.memory_space<vmem>>, vector<160x128xf32>
    %c0_1 = arith.constant 0 : index
    %c0_2 = arith.constant 0 : index
    %2 = vector.load %arg2[%c0_1, %c0_2] : memref<160x128xf32, #tpu.memory_space<vmem>>, vector<160x128xf32>
    %3 = arith.negf %1 : vector<160x128xf32>
    %4 = math.exp %3 : vector<160x128xf32>
    %cst_3 = arith.constant 1.000000e+00 : f32
    %5 = vector.broadcast %cst_3 : f32 to vector<160x128xf32>
    %6 = arith.addf %5, %4 : vector<160x128xf32>
    %7 = arith.divf %5, %6 : vector<160x128xf32>
    %8 = arith.subf %7, %2 : vector<160x128xf32>
    %9 = math.absf %8 : vector<160x128xf32>
    %10 = arith.mulf %9, %9 : vector<160x128xf32>
    %cst_4 = arith.constant 0.000000e+00 : f32
    %11 = vector.broadcast %cst_4 : f32 to vector<160x128xf32>
    %12 = arith.cmpf ogt, %2, %11 : vector<160x128xf32>
    %cst_5 = arith.constant 7.500000e-01 : f32
    %13 = vector.broadcast %cst_5 : f32 to vector<160x128xf32>
    %14 = arith.mulf %13, %10 : vector<160x128xf32>
    %15 = arith.select %12, %2, %14 : vector<160x128xi1>, vector<160x128xf32>
    %cst_6 = arith.constant 0.000000e+00 : f32
    %16 = vector.broadcast %cst_6 : f32 to vector<160x128xf32>
    %17 = arith.maximumf %1, %16 : vector<160x128xf32>
    %18 = arith.mulf %1, %2 : vector<160x128xf32>
    %19 = arith.subf %17, %18 : vector<160x128xf32>
    %cst_7 = arith.constant 1.000000e+00 : f32
    %20 = vector.broadcast %cst_7 : f32 to vector<160x128xf32>
    %21 = arith.subf %20, %7 : vector<160x128xf32>
    %22 = arith.maximumf %7, %21 : vector<160x128xf32>
    %23 = math.log %22 : vector<160x128xf32>
    %24 = arith.subf %19, %23 : vector<160x128xf32>
    %25 = arith.mulf %24, %15 : vector<160x128xf32>
    %26 = vector.shape_cast %25 : vector<160x128xf32> to vector<20x8x128xf32>
    %cst_8 = arith.constant dense<0.000000e+00> : vector<8x128xf32>
    %27 = vector.multi_reduction <add>, %26, %cst_8 [0] : vector<20x8x128xf32> to vector<8x128xf32>
    %28 = arith.addf %0, %27 : vector<8x128xf32>
    %c0_9 = arith.constant 0 : index
    %c0_10 = arith.constant 0 : index
    %29 = vector.load %arg3[%c0_9, %c0_10] : memref<8x128xf32, #tpu.memory_space<vmem>>, vector<8x128xf32>
    tpu.vector_store %arg3[%c0_9, %c0_10], %28 {strides = array<i32>} : memref<8x128xf32, #tpu.memory_space<vmem>>, vector<8x128xf32>,
    return
  }
  func.func @transform_0(%arg0: i32) -> (i32, i32) {
    %c0_i32 = arith.constant 0 : i32
    %c0_i32_0 = arith.constant 0 : i32
    return %arg0, %c0_i32 : i32, i32
  }
  func.func @transform_1(%arg0: i32) -> (i32, i32) {
    %c0_i32 = arith.constant 0 : i32
    %c0_i32_0 = arith.constant 0 : i32
    return %arg0, %c0_i32 : i32, i32
  }
  func.func @transform_2(%arg0: i32) -> (i32, i32) {
    %c0_i32 = arith.constant 0 : i32
    %c0_i32_0 = arith.constant 0 : i32
    return %arg0, %c0_i32 : i32, i32
  }
}

</mosaic_0001>

<bundles_post_ra>
// kernel: tpu_custom_call.1
= control target key start
LH: loop header
LB: loop body
LE: loop exit
PB: predicated region body
PF: predicated region fallthrough
CT: control target
= control target key end

     0   :  { %7 = vsyncpa [#allocation3], 0  ;;  %s1331_s0 = inlined_call_operand.hbm [shape: f32[160,128], index: 0, kind: input, shape index: {}]   ;;  %s1332_s1 = inlined_call_operand.hbm [shape: f32[160,128], index: 1, kind: input, shape index: {}]   ;;  %s1333_s2 = inlined_call_operand.hbm [shape: f32[8,128], index: 2, kind: output, shape index: {}]  }
   0x1   :  { %8 = vsyncpa [#allocation6], 0 }
   0x2   :  { %9 = vsyncpa [#allocation4], 0  ;;  %s754_s9 = smov [#allocation2]   ;;  %s682_s13 = scalar_lea.hbm %s1331_s0, 2560 }
   0x3   :  { %s15_s10 = sshll.u32 %s754_s9, 4  ;;  %p683_p0 = scmp.ne.s32.totalorder %s1331_s0, %s682_s13  ;;  %s16_s10 = int_to_ptr.vmem [resolvable:$true] %s15_s10 }
   0x4   :  { %p686_p1 = scmp.lt.u32.totalorder %s682_s13, %s1331_s0 }
   0x6   :  { %p688_p2 = pnand %p686_p1, %p683_p0 }
   0x8   :  { %691 = shalt.err (!%p688_p2)
}
   0x9   :  { %s692_s18 = scalar_lea.vmem %s16_s10, 2560  ;;  %p697_p4 = scmp.lt.s32.totalorder %s16_s10, %s16_s10 }
   0xa   :  { %p693_p3 = scmp.ne.s32.totalorder %s16_s10, %s692_s18  ;;  %p698_p5 = scmp.lt.s32.totalorder %s692_s18, %s692_s18 }
   0xc   :  { %p699_p6 = por %p698_p5, %p697_p4 }
   0xe   :  { %p700_p7 = pnand %p699_p6, %p693_p3 }
  0x10   :  { %703 = shalt.err (!%p700_p7)
}
  0x11   :  { %s755_s19 = smov 128   ;;  %s756_s20 = smov 8  }
  0x12   :  { %21 = dma.hbm_to_vmem [thread:$0]  %s1331_s0, 2560, %s16_s10, [#allocation3], %s755_s19, %s755_s19, %s756_s20  }
  0x13   :  { %s757_s23 = smov [#allocation5]   ;;  %s704_s27 = scalar_lea.hbm %s1332_s1, 2560 }
  0x14   :  { %s27_s24 = sshll.u32 %s757_s23, 4  ;;  %p705_p8 = scmp.ne.s32.totalorder %s1332_s1, %s704_s27  ;;  %s28_s24 = int_to_ptr.vmem [resolvable:$true] %s27_s24 }
  0x15   :  { %p708_p9 = scmp.lt.u32.totalorder %s704_s27, %s1332_s1 }
  0x17   :  { %p710_p10 = pnand %p708_p9, %p705_p8 }
  0x19   :  { %713 = shalt.err (!%p710_p10)
}
  0x1a   :  { %s714_s4 = scalar_lea.vmem %s28_s24, 2560  ;;  %p719_p12 = scmp.lt.s32.totalorder %s28_s24, %s28_s24 }
  0x1b   :  { %p715_p11 = scmp.ne.s32.totalorder %s28_s24, %s714_s4  ;;  %p720_p13 = scmp.lt.s32.totalorder %s714_s4, %s714_s4 }
  0x1d   :  { %p721_p0 = por %p720_p13, %p719_p12 }
  0x1f   :  { %p722_p1 = pnand %p721_p0, %p715_p11 }
  0x21   :  { %725 = shalt.err (!%p722_p1)
}
  0x22   :  { %33 = dma.hbm_to_vmem [thread:$0]  %s1332_s1, 2560, %s28_s24, [#allocation6], %s755_s19, %s755_s19, %s756_s20  }
  0x23   :  { %748 = dma.done.wait [#allocation3], 2560  }
  0x24   :  { %749 = vsyncadd [#allocation3], 4294964736 }
  0x25   :  { %750 = dma.done.wait [#allocation6], 2560  }
  0x26   :  { %751 = vsyncadd [#allocation6], 4294964736  ;;  %v798_v0 = vld [vmem:[#allocation2] sm:$0xff]  ;;  %v800_v1 = vld [vmem:[#allocation2 + $0x8] sm:$0xff]  ;;  %s758_s1 = smov [#allocation7]  }
  0x27   :  { %v802_v2 = vld [vmem:[#allocation2 + $0x10] sm:$0xff]  ;;  %v804_v3 = vld [vmem:[#allocation2 + $0x18] sm:$0xff]  ;;  %v537_v4 = vmul.f32 -1.442695, %v798_v0  ;;  %v807_v5 = vld [vmem:[#allocation2 + $0x20] sm:$0xff]  ;;  %s527_s6 = sshll.u32 %s758_s1, 4  ;;  %s528_s6 = int_to_ptr.vmem [resolvable:$true] %s527_s6 }
  0x28   :  { %1375 = vst [vmem:[#allocation11_spill] sm:$0xff] %v807_v5  ;;  %v538_v6 = vmul.f32 -1.442695, %v800_v1  ;;  %v810_v7 = vld [vmem:[#allocation2 + $0x28] sm:$0xff]  ;;  %v539_v8 = vmul.f32 -1.442695, %v802_v2  ;;  %p731_p3 = scmp.lt.s32.totalorder %s528_s6, %s528_s6 }
  0x29   :  { %1376 = vst [vmem:[#allocation12_spill] sm:$0xff] %v810_v7  ;;  %v813_v9 = vld [vmem:[#allocation2 + $0x30] sm:$0xff]  ;;  %v540_v10 = vmul.f32 -1.442695, %v804_v3  ;;  %v816_v11 = vld [vmem:[#allocation2 + $0x38] sm:$0xff]  ;;  %562 = vpow2.f32 %v537_v4  ;;  %v819_v13 = vld [vmem:[#allocation2 + $0x40] sm:$0xff] }
  0x2a   :  { %1377 = vst [vmem:[#allocation13_spill] sm:$0xff] %v813_v9  ;;  %1378 = vst [vmem:[#allocation14_spill] sm:$0xff] %v816_v11  ;;  %v541_v12 = vmul.f32 -1.442695, %v807_v5  ;;  %564 = vpow2.f32 %v538_v6  ;;  %v542_v14 = vmul.f32 -1.442695, %v810_v7 }
  0x2b   :  { %1379 = vst [vmem:[#allocation15_spill] sm:$0xff] %v819_v13  ;;  %v822_v15 = vld [vmem:[#allocation2 + $0x48] sm:$0xff]  ;;  %566 = vpow2.f32 %v539_v8  ;;  %v543_v16 = vmul.f32 -1.442695, %v813_v9  ;;  %v825_v17 = vld [vmem:[#allocation2 + $0x50] sm:$0xff]  ;;  %v828_v19 = vld [vmem:[#allocation2 + $0x58] sm:$0xff] }
  0x2c   :  { %1380 = vst [vmem:[#allocation16_spill] sm:$0xff] %v822_v15  ;;  %1381 = vst [vmem:[#allocation17_spill] sm:$0xff] %v825_v17  ;;  %568 = vpow2.f32 %v540_v10  ;;  %v544_v18 = vmul.f32 -1.442695, %v816_v11  ;;  %v545_v20 = vmul.f32 -1.442695, %v819_v13 }
  0x2d   :  { %1382 = vst [vmem:[#allocation18_spill] sm:$0xff] %v828_v19  ;;  %570 = vpow2.f32 %v541_v12  ;;  %v831_v21 = vld [vmem:[#allocation2 + $0x60] sm:$0xff]  ;;  %v546_v22 = vmul.f32 -1.442695, %v822_v15  ;;  %v834_v23 = vld [vmem:[#allocation2 + $0x68] sm:$0xff]  ;;  %v837_v25 = vld [vmem:[#allocation2 + $0x70] sm:$0xff] }
  0x2e   :  { %1383 = vst [vmem:[#allocation19_spill] sm:$0xff] %v831_v21  ;;  %572 = vpow2.f32 %v542_v14  ;;  %1384 = vst [vmem:[#allocation20_spill] sm:$0xff] %v834_v23  ;;  %v547_v24 = vmul.f32 -1.442695, %v825_v17  ;;  %v548_v26 = vmul.f32 -1.442695, %v828_v19 }
  0x2f   :  { %574 = vpow2.f32 %v543_v16  ;;  %1385 = vst [vmem:[#allocation21_spill] sm:$0xff] %v837_v25  ;;  %v840_v27 = vld [vmem:[#allocation2 + $0x78] sm:$0xff]  ;;  %v549_v28 = vmul.f32 -1.442695, %v831_v21  ;;  %v843_v29 = vld [vmem:[#allocation2 + $0x80] sm:$0xff]  ;;  %v846_v32 = vld [vmem:[#allocation2 + $0x88] sm:$0xff] }
  0x30   :  { %576 = vpow2.f32 %v544_v18  ;;  %1386 = vst [vmem:[#allocation22_spill] sm:$0xff] %v840_v27  ;;  %1387 = vst [vmem:[#allocation23_spill] sm:$0xff] %v843_v29  ;;  %v550_v30 = vmul.f32 -1.442695, %v834_v23  ;;  %v551_v33 = vmul.f32 -1.442695, %v837_v25 }
  0x31   :  { %578 = vpow2.f32 %v545_v20  ;;  %1388 = vst [vmem:[#allocation24_spill] sm:$0xff] %v846_v32  ;;  %v849_v35 = vld [vmem:[#allocation2 + $0x90] sm:$0xff]  ;;  %v552_v36 = vmul.f32 -1.442695, %v840_v27  ;;  %v852_v38 = vld [vmem:[#allocation2 + $0x98] sm:$0xff]  ;;  %v862_v59 = vld [vmem:[#allocation5] sm:$0xff] }
  0x32   :  { %580 = vpow2.f32 %v546_v22  ;;  %1389 = vst [vmem:[#allocation25_spill] sm:$0xff] %v849_v35  ;;  %1390 = vst [vmem:[#allocation26_spill] sm:$0xff] %v852_v38  ;;  %v553_v39 = vmul.f32 -1.442695, %v843_v29  ;;  %v554_v41 = vmul.f32 -1.442695, %v846_v32  ;;  %v874_v12 = vmul.f32 %v862_v59, %v798_v0 }
  0x33   :  { %v563_v31 = vpop.eup %562  ;;  %582 = vpow2.f32 %v547_v24  ;;  %v555_v43 = vmul.f32 -1.442695, %v849_v35  ;;  %v556_v45 = vmul.f32 -1.442695, %v852_v38  ;;  %v864_v60 = vld [vmem:[#allocation5 + $0x8] sm:$0xff]  ;;  %v868_v6 = vld [vmem:[#allocation5 + $0x10] sm:$0xff] }
  0x34   :  { %v565_v34 = vpop.eup %564  ;;  %584 = vpow2.f32 %v548_v26  ;;  %v140_v47 = vadd.f32 1.0, %v563_v31  ;;  %v870_v8 = vld [vmem:[#allocation5 + $0x18] sm:$0xff]  ;;  %v878_v14 = vmul.f32 %v864_v60, %v800_v1  ;;  %v880_v18 = vld [vmem:[#allocation5 + $0x20] sm:$0xff]  ;;  %v882_v20 = vld [vmem:[#allocation5 + $0x28] sm:$0xff]  ;;  %v886_v24 = vmul.f32 %v868_v6, %v802_v2  ;;  %s726_s7 = scalar_lea.vmem %s528_s6, 128 }
  0x35   :  { %v567_v37 = vpop.eup %566  ;;  %586 = vpow2.f32 %v549_v28  ;;  %v141_v49 = vadd.f32 1.0, %v565_v34  ;;  %v890_v26 = vmul.f32 %v870_v8, %v804_v3  ;;  %v894_v31 = vmul.f32 %v880_v18, %v807_v5  ;;  %v960_v62 = vld [vmem:[#allocation5 + $0x60] sm:$0xff]  ;;  %v970_v52 = vld [vmem:[#allocation5 + $0x68] sm:$0xff]  ;;  %v972_v38 = vld [vmem:[#allocation5 + $0x70] sm:$0xff]  ;;  %p727_p2 = scmp.ne.s32.totalorder %s528_s6, %s726_s7  ;;  %p732_p4 = scmp.lt.s32.totalorder %s726_s7, %s726_s7 }
  0x36   :  { %v569_v40 = vpop.eup %568  ;;  %588 = vpow2.f32 %v550_v30  ;;  %v142_v51 = vadd.f32 1.0, %v567_v37  ;;  %1402 = vst [vmem:[#allocation38_spill] sm:$0xff] %v960_v62  ;;  %1404 = vst [vmem:[#allocation40_spill] sm:$0xff] %v970_v52  ;;  %vm260_vm0 = vcmp.gt.f32.partialorder %v862_v59, 0.0  ;;  %vm261_vm1 = vcmp.gt.f32.partialorder %v864_v60, 0.0 }
  0x37   :  { %v571_v42 = vpop.eup %570  ;;  %590 = vpow2.f32 %v551_v33  ;;  %v143_v55 = vadd.f32 1.0, %v569_v40  ;;  %v898_v33 = vmul.f32 %v882_v20, %v810_v7  ;;  %1405 = vst [vmem:[#allocation41_spill] sm:$0xff] %v972_v38  ;;  %vm262_vm2 = vcmp.gt.f32.partialorder %v868_v6, 0.0  ;;  %p733_p5 = por %p732_p4, %p731_p3 }
  0x38   :  { %v573_v44 = vpop.eup %572  ;;  %592 = vpow2.f32 %v552_v36  ;;  %v144_v61 = vadd.f32 1.0, %v571_v42  ;;  %vm263_vm3 = vcmp.gt.f32.partialorder %v870_v8, 0.0  ;;  %vm264_vm4 = vcmp.gt.f32.partialorder %v880_v18, 0.0 }
  0x39   :  { %v575_v46 = vpop.eup %574  ;;  %594 = vpow2.f32 %v553_v39  ;;  %v145_v10 = vadd.f32 1.0, %v573_v44  ;;  %1391 = vst [vmem:[#allocation27_spill] sm:$0xff] %v898_v33  ;;  %vm265_vm5 = vcmp.gt.f32.partialorder %v882_v20, 0.0  ;;  %p734_p6 = pnand %p733_p5, %p727_p2 }
  0x3a   :  { %v577_v48 = vpop.eup %576  ;;  %596 = vpow2.f32 %v554_v41  ;;  %v146_v22 = vadd.f32 1.0, %v575_v46 }
  0x3b   :  { %v579_v50 = vpop.eup %578  ;;  %598 = vpow2.f32 %v555_v43  ;;  %v147_v30 = vadd.f32 1.0, %v577_v48  ;;  %v946_v43 = vld [vmem:[#allocation5 + $0x58] sm:$0xff] }
  0x3c   :  { %v581_v54 = vpop.eup %580  ;;  %600 = vpow2.f32 %v556_v45  ;;  %v148_v36 = vadd.f32 1.0, %v579_v50  ;;  %1399 = vst [vmem:[#allocation35_spill] sm:$0xff] %v946_v43  ;;  %v966_v56 = vmul.f32 %v946_v43, %v828_v19 }
  0x3d   :  { %v583_v58 = vpop.eup %582  ;;  %602 = vrcp.f32 %v140_v47  ;;  %v149_v37 = vadd.f32 1.0, %v581_v54 }
  0x3e   :  { %v585_v4 = vpop.eup %584  ;;  %604 = vrcp.f32 %v141_v49  ;;  %v150_v41 = vadd.f32 1.0, %v583_v58  ;;  %1403 = vst [vmem:[#allocation39_spill] sm:$0xff] %v966_v56 }
  0x3f   :  { %v587_v16 = vpop.eup %586  ;;  %606 = vrcp.f32 %v142_v51  ;;  %v151_v45 = vadd.f32 1.0, %v585_v4 }
  0x40   :  { %v589_v28 = vpop.eup %588  ;;  %608 = vrcp.f32 %v143_v55  ;;  %v152_v49 = vadd.f32 1.0, %v587_v16 }
  0x41   :  { %v591_v34 = vpop.eup %590  ;;  %610 = vrcp.f32 %v144_v61  ;;  %v153_v55 = vadd.f32 1.0, %v589_v28  ;;  %v919_v61 = vld [vmem:[#allocation5 + $0x38] sm:$0xff]  ;;  %v932_v28 = vld [vmem:[#allocation5 + $0x48] sm:$0xff] }
  0x42   :  { %v593_v40 = vpop.eup %592  ;;  %612 = vrcp.f32 %v145_v10  ;;  %v154_v10 = vadd.f32 1.0, %v591_v34  ;;  %1392 = vst [vmem:[#allocation28_spill] sm:$0xff] %v919_v61  ;;  %v921_v34 = vld [vmem:[#allocation5 + $0x40] sm:$0xff]  ;;  %1395 = vst [vmem:[#allocation31_spill] sm:$0xff] %v932_v28 }
  0x43   :  { %v595_v44 = vpop.eup %594  ;;  %614 = vrcp.f32 %v146_v22  ;;  %v155_v50 = vadd.f32 1.0, %v593_v40  ;;  %1393 = vst [vmem:[#allocation29_spill] sm:$0xff] %v921_v34  ;;  %v942_v46 = vmul.f32 %v921_v34, %v819_v13 }
  0x44   :  { %v597_v48 = vpop.eup %596  ;;  %616 = vrcp.f32 %v147_v30  ;;  %v913_v30 = vld [vmem:[#allocation5 + $0x30] sm:$0xff] }
  0x45   :  { %v599_v54 = vpop.eup %598  ;;  %618 = vrcp.f32 %v148_v36  ;;  %v928_v40 = vmul.f32 %v913_v30, %v813_v9  ;;  %v934_v36 = vld [vmem:[#allocation5 + $0x50] sm:$0xff]  ;;  %v157_v51 = vadd.f32 1.0, %v597_v48  ;;  %1398 = vst [vmem:[#allocation34_spill] sm:$0xff] %v942_v46  ;;  %v952_v48 = vmul.f32 %v932_v28, %v822_v15  ;;  %v982_v15 = vld [vmem:[#allocation5 + $0x78] sm:$0xff] }
  0x46   :  { %v601_v4 = vpop.eup %600  ;;  %620 = vrcp.f32 %v149_v37  ;;  %v156_v37 = vadd.f32 1.0, %v595_v44  ;;  %1396 = vst [vmem:[#allocation32_spill] sm:$0xff] %v934_v36  ;;  %v938_v44 = vmul.f32 %v919_v61, %v816_v11  ;;  %v158_v42 = vadd.f32 1.0, %v599_v54  ;;  %1407 = vst [vmem:[#allocation43_spill] sm:$0xff] %v982_v15 }
  0x47   :  { %v911_v16 = vpop.eup %602  ;;  %622 = vrcp.f32 %v150_v41  ;;  %1394 = vst [vmem:[#allocation30_spill] sm:$0xff] %v928_v40  ;;  %1400 = vst [vmem:[#allocation36_spill] sm:$0xff] %v952_v48  ;;  %v159_v57 = vadd.f32 1.0, %v601_v4  ;;  %v1000_v48 = vld [vmem:[#allocation5 + $0x88] sm:$0xff]  ;;  %v1006_v11 = vmul.f32 %v982_v15, %v840_v27  ;;  %v1028_v40 = vld [vmem:[#allocation5 + $0x90] sm:$0xff]  ;;  %vm266_vm6 = vcmp.gt.f32.partialorder %v913_v30, 0.0 }
  0x48   :  { %v917_v58 = vpop.eup %604  ;;  %v200_v47 = vsub.f32 %v911_v16, %v862_v59  ;;  %624 = vrcp.f32 %v151_v45  ;;  %1397 = vst [vmem:[#allocation33_spill] sm:$0xff] %v938_v44  ;;  %v956_v45 = vmul.f32 %v934_v36, %v825_v17 }
  0x49   :  { %v930_v41 = vpop.eup %606  ;;  %v201_v39 = vsub.f32 %v917_v58, %v864_v60  ;;  %626 = vrcp.f32 %v152_v49  ;;  %v978_v49 = vmul.f32 %v960_v62, %v831_v21  ;;  %1411 = vst [vmem:[#allocation47_spill] sm:$0xff] %v1006_v11 }
  0x4a   :  { %v944_v22 = vpop.eup %608  ;;  %1401 = vst [vmem:[#allocation37_spill] sm:$0xff] %v956_v45  ;;  %v202_v54 = vsub.f32 %v930_v41, %v868_v6  ;;  %628 = vrcp.f32 %v153_v55  ;;  %v220_v45 = vand.u32 2147483647, %v200_v47  ;;  %v990_v55 = vmul.f32 %v970_v52, %v834_v23 }
  0x4b   :  { %v958_v63 = vpop.eup %610  ;;  %v203_v17 = vsub.f32 %v944_v22, %v870_v8  ;;  %1406 = vst [vmem:[#allocation42_spill] sm:$0xff] %v978_v49  ;;  %v994_v47 = vmul.f32 %v972_v38, %v837_v25  ;;  %v998_v49 = vld [vmem:[#allocation5 + $0x80] sm:$0xff]  ;;  %630 = vrcp.f32 %v154_v10  ;;  %v221_v46 = vand.u32 2147483647, %v201_v39 }
  0x4c   :  { %v968_v53 = vpop.eup %612  ;;  %v204_v19 = vsub.f32 %v958_v63, %v880_v18  ;;  %1408 = vst [vmem:[#allocation44_spill] sm:$0xff] %v990_v55  ;;  %1410 = vst [vmem:[#allocation46_spill] sm:$0xff] %v998_v49  ;;  %v1014_v55 = vmul.f32 %v998_v49, %v843_v29  ;;  %v1018_v10 = vmul.f32 %v1000_v48, %v846_v32  ;;  %632 = vrcp.f32 %v155_v50 }
  0x4d   :  { %v980_v4 = vpop.eup %614  ;;  %v205_v56 = vsub.f32 %v968_v53, %v882_v20  ;;  %1409 = vst [vmem:[#allocation45_spill] sm:$0xff] %v994_v47  ;;  %v222_v47 = vand.u32 2147483647, %v202_v54  ;;  %v223_v27 = vand.u32 2147483647, %v203_v17  ;;  %v240_v11 = vmul.f32 %v220_v45, %v220_v45 }
  0x4e   :  { %v996_v21 = vpop.eup %616  ;;  %v206_v13 = vsub.f32 %v980_v4, %v913_v30  ;;  %1412 = vst [vmem:[#allocation48_spill] sm:$0xff] %v1014_v55  ;;  %1413 = vst [vmem:[#allocation49_spill] sm:$0xff] %v1018_v10  ;;  %634 = vrcp.f32 %v156_v37  ;;  %v224_v29 = vand.u32 2147483647, %v204_v19  ;;  %v241_v10 = vmul.f32 %v221_v46, %v221_v46 }
  0x4f   :  { %v1008_v23 = vpop.eup %618  ;;  %v207_v25 = vsub.f32 %v996_v21, %v919_v61  ;;  %v225_v55 = vand.u32 2147483647, %v205_v56  ;;  %636 = vrcp.f32 %v157_v51  ;;  %v242_v45 = vmul.f32 %v222_v47, %v222_v47 }
  0x50   :  { %v1020_v44 = vpop.eup %620  ;;  %v208_v39 = vsub.f32 %v1008_v23, %v921_v34  ;;  %v226_v50 = vand.u32 2147483647, %v206_v13  ;;  %638 = vrcp.f32 %v158_v42  ;;  %v1036_v37 = vmul.f32 %v1028_v40, %v849_v35 }
  0x51   :  { %v1024_v9 = vpop.eup %622  ;;  %v209_v54 = vsub.f32 %v1020_v44, %v932_v28  ;;  %v227_v17 = vand.u32 2147483647, %v207_v25  ;;  %640 = vrcp.f32 %v159_v57  ;;  %v243_v51 = vmul.f32 %v223_v27, %v223_v27 }
  0x52   :  { %v210_v32 = vsub.f32 %v1024_v9, %v934_v36  ;;  %v1032_v7 = vpop.eup %624  ;;  %1414 = vst [vmem:[#allocation50_spill] sm:$0xff] %v1036_v37  ;;  %v228_v56 = vand.u32 2147483647, %v208_v39  ;;  %v244_v13 = vmul.f32 %v224_v29, %v224_v29  ;;  %v245_v46 = vmul.f32 %v225_v55, %v225_v55 }
  0x53   :  { %v211_v19 = vsub.f32 %v1032_v7, %v946_v43  ;;  %v1040_v28 = vpop.eup %626  ;;  %v229_v36 = vand.u32 2147483647, %v209_v54  ;;  %v1042_v34 = vmul.f32 0.75, %v240_v11  ;;  %v246_v35 = vmul.f32 %v226_v50, %v226_v50 }
  0x54   :  { %v1044_v42 = vpop.eup %628  ;;  %v212_v25 = vsub.f32 %v1040_v28, %v960_v62  ;;  %v230_v47 = vand.u32 2147483647, %v210_v32  ;;  %v1048_v57 = vmul.f32 0.75, %v241_v10  ;;  %v247_v27 = vmul.f32 %v227_v17, %v227_v17 }
  0x55   :  { %v213_v39 = vsub.f32 %v1044_v42, %v970_v52  ;;  %v1052_v37 = vmul.f32 0.75, %v242_v45  ;;  %v380_v29 = vsub.f32 1.0, %v911_v16  ;;  %v1055_v55 = vpop.eup %630  ;;  %v231_v11 = vand.u32 2147483647, %v211_v19 }
  0x56   :  { %1415 = vst [vmem:[#allocation51_spill] sm:$0xff] %v1055_v55  ;;  %v248_v54 = vmul.f32 %v228_v56, %v228_v56  ;;  %v1057_v43 = vmul.f32 0.75, %v243_v51  ;;  %v381_v62 = vsub.f32 1.0, %v917_v58  ;;  %v214_v32 = vsub.f32 %v1055_v55, %v972_v38  ;;  %v1065_v45 = vpop.eup %632 }
  0x57   :  { %v249_v10 = vmul.f32 %v229_v36, %v229_v36  ;;  %v1062_v50 = vmul.f32 0.75, %v244_v13  ;;  %v382_v17 = vsub.f32 1.0, %v930_v41  ;;  %1416 = vst [vmem:[#allocation52_spill] sm:$0xff] %v1065_v45  ;;  %v232_v52 = vand.u32 2147483647, %v212_v25 }
  0x58   :  { %v250_v33 = vmul.f32 %v230_v47, %v230_v47  ;;  %v1067_v61 = vmul.f32 0.75, %v245_v46  ;;  %v383_v19 = vsub.f32 1.0, %v944_v22  ;;  %v1070_v56 = vpop.eup %634  ;;  %v215_v51 = vsub.f32 %v1065_v45, %v982_v15 }
  0x59   :  { %v233_v5 = vand.u32 2147483647, %v213_v39  ;;  %v384_v36 = vsub.f32 1.0, %v958_v63  ;;  %v400_v13 = vmax.f32 %v911_v16, %v380_v29  ;;  %v1076_v38 = vpop.eup %636  ;;  %v1078_v55 = vmul.f32 %v231_v11, %v231_v11 }
  0x5a   :  { %v1084_v46 = vmul.f32 0.75, %v246_v35  ;;  %v385_v25 = vsub.f32 1.0, %v968_v53  ;;  %v401_v47 = vmax.f32 %v917_v58, %v381_v62  ;;  %v1088_v39 = vpop.eup %638  ;;  %v216_v16 = vsub.f32 %v1070_v56, %v998_v49 }
  0x5b   :  { %1417 = vst [vmem:[#allocation53_spill] sm:$0xff] %v1078_v55  ;;  %v234_v29 = vand.u32 2147483647, %v214_v32  ;;  %v386_v11 = vsub.f32 1.0, %v980_v4  ;;  %v402_v15 = vmax.f32 %v930_v41, %v382_v17  ;;  %v1094_v55 = vpop.eup %640  ;;  %v1096_v45 = vmul.f32 %v232_v52, %v232_v52  ;;  %v1107_v17 = vld [vmem:[#allocation5 + $0x98] sm:$0xff] }
  0x5c   :  { %v1100_v35 = vmul.f32 0.75, %v247_v27  ;;  %v387_v62 = vsub.f32 1.0, %v996_v21  ;;  %v403_v58 = vmax.f32 %v944_v22, %v383_v19  ;;  %v217_v32 = vsub.f32 %v1076_v38, %v1000_v48 }
  0x5d   :  { %1418 = vst [vmem:[#allocation54_spill] sm:$0xff] %v1096_v45  ;;  %v235_v49 = vand.u32 2147483647, %v215_v51  ;;  %v404_v41 = vmax.f32 %v958_v63, %v384_v36  ;;  %642 = vlog2.f32 %v400_v13  ;;  %v1109_v52 = vmul.f32 %v233_v5, %v233_v5 }
  0x5e   :  { %1419 = vst [vmem:[#allocation55_spill] sm:$0xff] %v1100_v35  ;;  %v388_v45 = vsub.f32 1.0, %v1008_v23  ;;  %v405_v27 = vmax.f32 %v968_v53, %v385_v25  ;;  %644 = vlog2.f32 %v401_v47  ;;  %v218_v35 = vsub.f32 %v1088_v39, %v1028_v40 }
  0x5f   :  { %v1115_v22 = vmul.f32 0.75, %v248_v54  ;;  %v406_v19 = vmax.f32 %v980_v4, %v386_v11  ;;  %646 = vlog2.f32 %v402_v15  ;;  %v236_v51 = vand.u32 2147483647, %v216_v16 }
  0x60   :  { %v389_v63 = vsub.f32 1.0, %v1020_v44  ;;  %v407_v36 = vmax.f32 %v996_v21, %v387_v62  ;;  %648 = vlog2.f32 %v403_v58  ;;  %v219_v5 = vsub.f32 %v1094_v55, %v1107_v17  ;;  %v1424_v62 = vld [vmem:[#allocation11_spill] sm:$0xff] }
  0x61   :  { %v1122_v13 = vmul.f32 %v234_v29, %v234_v29  ;;  %v1124_v53 = vmul.f32 0.75, %v249_v10  ;;  %650 = vlog2.f32 %v404_v41  ;;  %v1126_v25 = vand.u32 2147483647, %v217_v32  ;;  %v1426_v58 = vld [vmem:[#allocation51_spill] sm:$0xff] }
  0x62   :  { %v390_v54 = vsub.f32 1.0, %v1024_v9  ;;  %v408_v15 = vmax.f32 %v1008_v23, %v388_v45  ;;  %652 = vlog2.f32 %v405_v27  ;;  %v1130_v4 = vand.u32 2147483647, %v218_v35 }
  0x63   :  { %v1132_v47 = vmul.f32 %v235_v49, %v235_v49  ;;  %v1135_v21 = vmul.f32 0.75, %v250_v33  ;;  %654 = vlog2.f32 %v406_v19  ;;  %v1137_v16 = vmul.f32 %v236_v51, %v236_v51  ;;  %v1427_v51 = vld [vmem:[#allocation28_spill] sm:$0xff] }
  0x64   :  { %v391_v10 = vsub.f32 1.0, %v1032_v7  ;;  %v409_v29 = vmax.f32 %v1020_v44, %v389_v63  ;;  %656 = vlog2.f32 %v407_v36  ;;  %v300_v23 = vsel %vm260_vm0, %v862_v59, %v1042_v34  ;;  %v1428_v63 = vld [vmem:[#allocation27_spill] sm:$0xff]  ;;  %v1429_v36 = vld [vmem:[#allocation12_spill] sm:$0xff] }
  0x65   :  { %v301_v49 = vsel %vm261_vm1, %v864_v60, %v1048_v57  ;;  %v302_v33 = vsel %vm262_vm2, %v868_v6, %v1052_v37  ;;  %v303_v44 = vsel %vm263_vm3, %v870_v8, %v1057_v43  ;;  %v1420_v45 = vmax.f32 %v798_v0, 0.0 }
  0x66   :  { %v392_v59 = vsub.f32 1.0, %v1040_v28  ;;  %v410_v34 = vmax.f32 %v1024_v9, %v390_v54  ;;  %658 = vlog2.f32 %v408_v15  ;;  %v1166_v6 = vsel %vm264_vm4, %v880_v18, %v1062_v50  ;;  %v1431_v54 = vld [vmem:[#allocation52_spill] sm:$0xff] }
  0x67   :  { %v360_v11 = vsub.f32 %v1420_v45, %v874_v12  ;;  %v643_v60 = vpop.eup %642  ;;  %v1172_v8 = vsel %vm265_vm5, %v882_v20, %v1067_v61  ;;  %v1421_v0 = vmax.f32 %v800_v1, 0.0  ;;  %v1422_v9 = vmax.f32 %v802_v2, 0.0 }
  0x68   :  { %v645_v37 = vpop.eup %644  ;;  %v393_v57 = vsub.f32 1.0, %v1044_v42  ;;  %v411_v18 = vmax.f32 %v1032_v7, %v391_v10  ;;  %v421_v50 = vmul.f32 0.6931472, %v643_v60  ;;  %660 = vlog2.f32 %v409_v29 }
  0x69   :  { %v361_v12 = vsub.f32 %v1421_v0, %v878_v14  ;;  %v362_v43 = vsub.f32 %v1422_v9, %v886_v24  ;;  %v647_v35 = vpop.eup %646  ;;  %v1423_v20 = vmax.f32 %v804_v3, 0.0  ;;  %v1425_v1 = vmax.f32 %v1424_v62, 0.0 }
  0x6a   :  { %v394_v32 = vsub.f32 1.0, %v1426_v58  ;;  %v423_v2 = vmul.f32 0.6931472, %v645_v37  ;;  %v649_v24 = vpop.eup %648  ;;  %v412_v41 = vmax.f32 %v1040_v28, %v392_v59  ;;  %v425_v27 = vmul.f32 0.6931472, %v647_v35 }
  0x6b   :  { %v363_v61 = vsub.f32 %v1423_v20, %v890_v26  ;;  %v364_v14 = vsub.f32 %v1425_v1, %v894_v31  ;;  %662 = vlog2.f32 %v410_v34  ;;  %v460_v7 = vsub.f32 %v360_v11, %v421_v50  ;;  %v651_v19 = vpop.eup %650  ;;  %v1432_v34 = vld [vmem:[#allocation29_spill] sm:$0xff] }
  0x6c   :  { %vm267_vm7 = vcmp.gt.f32.partialorder %v1427_v51, 0.0  ;;  %v1430_v3 = vmax.f32 %v1429_v36, 0.0  ;;  %v395_v15 = vsub.f32 1.0, %v1431_v54  ;;  %v427_v10 = vmul.f32 0.6931472, %v649_v24  ;;  %v653_v29 = vpop.eup %652  ;;  %v1438_v24 = vld [vmem:[#allocation14_spill] sm:$0xff] }
  0x6d   :  { %v461_v31 = vsub.f32 %v361_v12, %v423_v2  ;;  %v413_v45 = vmax.f32 %v1044_v42, %v393_v57  ;;  %v429_v60 = vmul.f32 0.6931472, %v651_v19  ;;  %664 = vlog2.f32 %v411_v18  ;;  %v655_v59 = vpop.eup %654  ;;  %v1433_v57 = vld [vmem:[#allocation31_spill] sm:$0xff]  ;;  %v1435_v18 = vld [vmem:[#allocation13_spill] sm:$0xff] }
  0x6e   :  { %v365_v26 = vsub.f32 %v1430_v3, %v1428_v63  ;;  %v462_v28 = vsub.f32 %v362_v43, %v425_v27  ;;  %vm268_vm8 = vcmp.gt.f32.partialorder %v1432_v34, 0.0  ;;  %v431_v11 = vmul.f32 0.6931472, %v653_v29  ;;  %v657_v50 = vpop.eup %656  ;;  %v1434_v43 = vld [vmem:[#allocation30_spill] sm:$0xff]  ;;  %v1437_v2 = vld [vmem:[#allocation33_spill] sm:$0xff] }
  0x6f   :  { %v463_v0 = vsub.f32 %v363_v61, %v427_v10  ;;  %v480_v9 = vmul.f32 %v460_v7, %v300_v23  ;;  %v481_v37 = vmul.f32 %v461_v31, %v301_v49  ;;  %v306_v35 = vsel %vm266_vm6, %v913_v30, %v1084_v46  ;;  %v1441_v3 = vld [vmem:[#allocation34_spill] sm:$0xff] }
  0x70   :  { %v396_v12 = vsub.f32 1.0, %v1070_v56  ;;  %v414_v42 = vmax.f32 %v1426_v58, %v394_v32  ;;  %666 = vlog2.f32 %v412_v41  ;;  %vm269_vm9 = vcmp.gt.f32.partialorder %v1433_v57, 0.0  ;;  %v659_v1 = vpop.eup %658  ;;  %v1440_v58 = vld [vmem:[#allocation32_spill] sm:$0xff] }
  0x71   :  { %v1436_v20 = vmax.f32 %v1435_v18, 0.0  ;;  %v433_v61 = vmul.f32 0.6931472, %v655_v59  ;;  %v464_v23 = vsub.f32 %v364_v14, %v429_v60  ;;  %v482_v49 = vmul.f32 %v462_v28, %v302_v33  ;;  %v1442_v14 = vld [vmem:[#allocation15_spill] sm:$0xff]  ;;  %v1446_v59 = vld [vmem:[#allocation16_spill] sm:$0xff] }
  0x72   :  { %v1439_v27 = vmax.f32 %v1438_v24, 0.0  ;;  %v397_v30 = vsub.f32 1.0, %v1076_v38  ;;  %v415_v46 = vmax.f32 %v1431_v54, %v395_v15  ;;  %668 = vlog2.f32 %v413_v45  ;;  %v661_v36 = vpop.eup %660  ;;  %v1444_v60 = vld [vmem:[#allocation35_spill] sm:$0xff] }
  0x73   :  { %v366_v62 = vsub.f32 %v1436_v20, %v1434_v43  ;;  %vm270_vm10 = vcmp.gt.f32.partialorder %v1440_v58, 0.0  ;;  %v435_v32 = vmul.f32 0.6931472, %v657_v50  ;;  %v465_v41 = vsub.f32 %v365_v26, %v431_v11  ;;  %v1448_v50 = vld [vmem:[#allocation38_spill] sm:$0xff] }
  0x74   :  { %v367_v7 = vsub.f32 %v1439_v27, %v1437_v2  ;;  %v483_v19 = vmul.f32 %v463_v0, %v303_v44  ;;  %v500_v63 = vadd.f32 %v481_v37, %v480_v9  ;;  %v1443_v33 = vmax.f32 %v1442_v14, 0.0  ;;  %v1445_v44 = vld [vmem:[#allocation36_spill] sm:$0xff] }
  0x75   :  { %v398_v31 = vsub.f32 1.0, %v1088_v39  ;;  %v416_v29 = vmax.f32 %v1070_v56, %v396_v12  ;;  %670 = vlog2.f32 %v414_v42  ;;  %vm271_vm11 = vcmp.gt.f32.partialorder %v1444_v60, 0.0  ;;  %v663_v26 = vpop.eup %662 }
  0x76   :  { %v368_v10 = vsub.f32 %v1443_v33, %v1441_v3  ;;  %v437_v54 = vmul.f32 0.6931472, %v659_v1  ;;  %v466_v15 = vsub.f32 %v366_v62, %v433_v61  ;;  %v484_v45 = vmul.f32 %v464_v23, %v1166_v6  ;;  %v1449_v6 = vld [vmem:[#allocation55_spill] sm:$0xff]  ;;  %v1450_v62 = vld [vmem:[#allocation37_spill] sm:$0xff]  ;;  %v1453_v1 = vld [vmem:[#allocation40_spill] sm:$0xff] }
  0x77   :  { %v501_v28 = vadd.f32 %v500_v63, %v482_v49  ;;  %v1447_v11 = vmax.f32 %v1446_v59, 0.0  ;;  %v399_v9 = vsub.f32 1.0, %v1094_v55  ;;  %v417_v37 = vmax.f32 %v1076_v38, %v397_v30  ;;  %v665_v18 = vpop.eup %664  ;;  %v1451_v61 = vld [vmem:[#allocation17_spill] sm:$0xff] }
  0x78   :  { %672 = vlog2.f32 %v415_v46  ;;  %vm272_vm12 = vcmp.gt.f32.partialorder %v1448_v50, 0.0  ;;  %v439_v56 = vmul.f32 0.6931472, %v661_v36  ;;  %v467_v12 = vsub.f32 %v367_v7, %v435_v32  ;;  %v1455_v46 = vld [vmem:[#allocation18_spill] sm:$0xff]  ;;  %v1458_v33 = vld [vmem:[#allocation53_spill] sm:$0xff] }
  0x79   :  { %v369_v0 = vsub.f32 %v1447_v11, %v1445_v44  ;;  %v485_v42 = vmul.f32 %v465_v41, %v1172_v8  ;;  %v502_v43 = vadd.f32 %v501_v28, %v483_v19  ;;  %v307_v20 = vsel %vm267_vm7, %v1427_v51, %v1449_v6  ;;  %v1454_v51 = vld [vmem:[#allocation39_spill] sm:$0xff]  ;;  %v1463_v11 = vld [vmem:[#allocation54_spill] sm:$0xff] }
  0x7a   :  { %v1452_v23 = vmax.f32 %v1451_v61, 0.0  ;;  %v418_v38 = vmax.f32 %v1088_v39, %v398_v31  ;;  %674 = vlog2.f32 %v416_v29  ;;  %vm273_vm13 = vcmp.gt.f32.partialorder %v1453_v1, 0.0  ;;  %v667_v7 = vpop.eup %666  ;;  %v1457_v39 = vld [vmem:[#allocation41_spill] sm:$0xff]  ;;  %v1460_v31 = vld [vmem:[#allocation19_spill] sm:$0xff] }
  0x7b   :  { %v441_v2 = vmul.f32 0.6931472, %v663_v26  ;;  %v468_v24 = vsub.f32 %v368_v10, %v437_v54  ;;  %v486_v27 = vmul.f32 %v466_v15, %v306_v35  ;;  %v503_v8 = vadd.f32 %v502_v43, %v484_v45  ;;  %v1462_v15 = vld [vmem:[#allocation43_spill] sm:$0xff] }
  0x7c   :  { %v370_v49 = vsub.f32 %v1452_v23, %v1450_v62  ;;  %v308_v30 = vsel %vm268_vm8, %v1432_v34, %v1115_v22  ;;  %v1456_v32 = vmax.f32 %v1455_v46, 0.0  ;;  %v419_v19 = vmax.f32 %v1094_v55, %v399_v9  ;;  %v669_v14 = vpop.eup %668  ;;  %v1459_v34 = vld [vmem:[#allocation42_spill] sm:$0xff]  ;;  %v1469_v23 = vld [vmem:[#allocation21_spill] sm:$0xff] }
  0x7d   :  { %676 = vlog2.f32 %v417_v37  ;;  %vm274_vm14 = vcmp.gt.f32.partialorder %v1457_v39, 0.0  ;;  %v443_v63 = vmul.f32 0.6931472, %v665_v18  ;;  %v469_v36 = vsub.f32 %v369_v0, %v439_v56 }
  0x7e   :  { %v371_v41 = vsub.f32 %v1456_v32, %v1454_v51  ;;  %v487_v3 = vmul.f32 %v467_v12, %v307_v20  ;;  %v504_v35 = vadd.f32 %v503_v8, %v485_v42  ;;  %v291_v10 = vmul.f32 0.75, %v1458_v33  ;;  %v1467_v12 = vld [vmem:[#allocation46_spill] sm:$0xff] }
  0x7f   :  { %v309_v22 = vsel %vm269_vm9, %v1433_v57, %v1124_v53  ;;  %v1461_v29 = vmax.f32 %v1460_v31, 0.0  ;;  %678 = vlog2.f32 %v418_v38  ;;  %vm275_vm15 = vcmp.gt.f32.partialorder %v1462_v15, 0.0  ;;  %v671_v59 = vpop.eup %670  ;;  %v1464_v53 = vld [vmem:[#allocation44_spill] sm:$0xff] }
  0x80   :  { %v445_v45 = vmul.f32 0.6931472, %v667_v7  ;;  %v470_v28 = vsub.f32 %v370_v49, %v441_v2  ;;  %v488_v26 = vmul.f32 %v468_v24, %v308_v30  ;;  %v505_v44 = vadd.f32 %v504_v35, %v486_v27  ;;  %v1465_v57 = vld [vmem:[#allocation20_spill] sm:$0xff]  ;;  %v1472_v30 = vld [vmem:[#allocation22_spill] sm:$0xff] }
  0x81   :  { %v372_v54 = vsub.f32 %v1461_v29, %v1459_v34  ;;  %v292_v0 = vmul.f32 0.75, %v1463_v11  ;;  %v310_v9 = vsel %vm270_vm10, %v1440_v58, %v1135_v21  ;;  %v1466_v37 = vmax.f32 %v1465_v57, 0.0  ;;  %v1468_v58 = vld [vmem:[#allocation45_spill] sm:$0xff]  ;;  %v1474_v35 = vld [vmem:[#allocation48_spill] sm:$0xff] }
  0x82   :  { %680 = vlog2.f32 %v419_v19  ;;  %vm276_vm0 = vcmp.gt.f32.partialorder %v1467_v12, 0.0  ;;  %v447_v42 = vmul.f32 0.6931472, %v669_v14  ;;  %v471_v43 = vsub.f32 %v371_v41, %v443_v63  ;;  %v673_v20 = vpop.eup %672 }
  0x83   :  { %v373_v56 = vsub.f32 %v1466_v37, %v1464_v53  ;;  %v489_v18 = vmul.f32 %v469_v36, %v309_v22  ;;  %v506_v6 = vadd.f32 %v505_v44, %v487_v3  ;;  %v239_v62 = vand.u32 2147483647, %v219_v5 }
  0x84   :  { %v293_v61 = vmul.f32 0.75, %v1109_v52  ;;  %v311_v21 = vsel %vm271_vm11, %v1444_v60, %v291_v10  ;;  %v1470_v49 = vmax.f32 %v1469_v23, 0.0  ;;  %vm277_vm1 = vcmp.gt.f32.partialorder %v1000_v48, 0.0  ;;  %v675_v7 = vpop.eup %674  ;;  %v1471_v60 = vld [vmem:[#allocation47_spill] sm:$0xff] }
  0x85   :  { %v449_v2 = vmul.f32 0.6931472, %v671_v59  ;;  %v472_v24 = vsub.f32 %v372_v54, %v445_v45  ;;  %v490_v27 = vmul.f32 %v470_v28, %v310_v9  ;;  %v507_v8 = vadd.f32 %v506_v6, %v488_v26  ;;  %v1478_v28 = vld [vmem:[#allocation49_spill] sm:$0xff] }
  0x86   :  { %v374_v38 = vsub.f32 %v1470_v49, %v1468_v58  ;;  %v257_v55 = vmul.f32 %v1126_v25, %v1126_v25  ;;  %v294_v52 = vmul.f32 0.75, %v1122_v13  ;;  %v312_v5 = vsel %vm272_vm12, %v1448_v50, %v292_v0  ;;  %v1475_v50 = vld [vmem:[#allocation23_spill] sm:$0xff] }
  0x87   :  { %v1473_v51 = vmax.f32 %v1472_v30, 0.0  ;;  %v451_v32 = vmul.f32 0.6931472, %v673_v20  ;;  %v473_v41 = vsub.f32 %v373_v56, %v447_v42  ;;  %v491_v19 = vmul.f32 %v471_v43, %v311_v21  ;;  %v677_v36 = vpop.eup %676  ;;  %v1481_v56 = vld [vmem:[#allocation50_spill] sm:$0xff] }
  0x88   :  { %v508_v63 = vadd.f32 %v507_v8, %v489_v18  ;;  %v258_v3 = vmul.f32 %v1130_v4, %v1130_v4  ;;  %v295_v25 = vmul.f32 0.75, %v1132_v47  ;;  %v313_v13 = vsel %vm273_vm13, %v1453_v1, %v293_v61  ;;  %v1477_v47 = vld [vmem:[#allocation26_spill] sm:$0xff]  ;;  %v1479_v1 = vld [vmem:[#allocation24_spill] sm:$0xff] }
  0x89   :  { %v375_v46 = vsub.f32 %v1473_v51, %v1471_v60  ;;  %v1476_v14 = vmax.f32 %v1475_v50, 0.0  ;;  %v453_v10 = vmul.f32 0.6931472, %v675_v7  ;;  %v474_v22 = vsub.f32 %v374_v38, %v449_v2  ;;  %v679_v29 = vpop.eup %678 }
  0x8a   :  { %v492_v34 = vmul.f32 %v472_v24, %v312_v5  ;;  %v509_v31 = vadd.f32 %v508_v63, %v490_v27  ;;  %v296_v54 = vmul.f32 0.75, %v1137_v16  ;;  %v314_v4 = vsel %vm274_vm14, %v1457_v39, %v294_v52  ;;  %v1482_v39 = vld [vmem:[#allocation25_spill] sm:$0xff] }
  0x8b   :  { %v376_v33 = vsub.f32 %v1476_v14, %v1474_v35  ;;  %v359_v45 = vmul.f32 %v1107_v17, %v1477_v47  ;;  %v1480_v26 = vmax.f32 %v1479_v1, 0.0  ;;  %v455_v59 = vmul.f32 0.6931472, %v677_v36 }
  0x8c   :  { %v475_v11 = vsub.f32 %v375_v46, %v451_v32  ;;  %v493_v0 = vmul.f32 %v473_v41, %v313_v13  ;;  %v510_v9 = vadd.f32 %v509_v31, %v491_v19  ;;  %v681_v53 = vpop.eup %680  ;;  %v259_v57 = vmul.f32 %v239_v62, %v239_v62 }
  0x8d   :  { %v377_v44 = vsub.f32 %v1480_v26, %v1478_v28  ;;  %v297_v37 = vmul.f32 0.75, %v257_v55  ;;  %v315_v16 = vsel %vm275_vm15, %v1462_v15, %v295_v25  ;;  %v1483_v42 = vmax.f32 %v1482_v39, 0.0 }
  0x8e   :  { %v457_v18 = vmul.f32 0.6931472, %v679_v29  ;;  %v476_v6 = vsub.f32 %v376_v33, %v453_v10  ;;  %v494_v20 = vmul.f32 %v474_v22, %v314_v4  ;;  %v511_v61 = vadd.f32 %v510_v9, %v492_v34 }
  0x8f   :  { %v378_v43 = vsub.f32 %v1483_v42, %v1481_v56  ;;  %vm278_vm2 = vcmp.gt.f32.partialorder %v1028_v40, 0.0  ;;  %v298_v21 = vmul.f32 0.75, %v258_v3  ;;  %v316_v62 = vsel %vm276_vm0, %v1467_v12, %v296_v54 }
  0x90   :  { %v1484_v58 = vmax.f32 %v1477_v47, 0.0  ;;  %v459_v49 = vmul.f32 0.6931472, %v681_v53  ;;  %v477_v15 = vsub.f32 %v377_v44, %v455_v59  ;;  %v495_v38 = vmul.f32 %v475_v11, %v315_v16 }
  0x91   :  { %v512_v2 = vadd.f32 %v511_v61, %v493_v0  ;;  %v299_v24 = vmul.f32 0.75, %v259_v57  ;;  %v317_v27 = vsel %vm277_vm1, %v1000_v48, %v297_v37  ;;  %vm279_vm3 = vcmp.gt.f32.partialorder %v1107_v17, 0.0 }
  0x92   :  { %v379_v23 = vsub.f32 %v1484_v58, %v359_v45  ;;  %v478_v8 = vsub.f32 %v378_v43, %v457_v18  ;;  %v496_v7 = vmul.f32 %v476_v6, %v316_v62  ;;  %v318_v52 = vsel %vm278_vm2, %v1028_v40, %v298_v21 }
  0x93   :  { %v513_v55 = vadd.f32 %v512_v2, %v494_v20  ;;  %v497_v5 = vmul.f32 %v477_v15, %v317_v27  ;;  %v319_v30 = vsel %vm279_vm3, %v1107_v17, %v299_v24 }
  0x94   :  { %v479_v12 = vsub.f32 %v379_v23, %v459_v49  ;;  %v498_v51 = vmul.f32 %v478_v8, %v318_v52 }
  0x95   :  { %v514_v60 = vadd.f32 %v513_v55, %v495_v38 }
  0x96   :  { %v499_v32 = vmul.f32 %v479_v12, %v319_v30 }
  0x97   :  { %v515_v46 = vadd.f32 %v514_v60, %v496_v7 }
  0x99   :  { %v516_v41 = vadd.f32 %v515_v46, %v497_v5 }
  0x9b   :  { %v517_v19 = vadd.f32 %v516_v41, %v498_v51 }
  0x9d   :  { %v518_v48 = vadd.f32 %v517_v19, %v499_v32 }
  0x9f   :  { %520 = vst [vmem:[#allocation7] sm:$0xff] %v518_v48 }
  0xa0   :  { %737 = shalt.err (!%p734_p6)
}
  0xa1   :  { %s738_s10 = scalar_lea.hbm %s1333_s2, 128 }
  0xa2   :  { %p739_p7 = scmp.ne.s32.totalorder %s1333_s2, %s738_s10  ;;  %p742_p8 = scmp.lt.u32.totalorder %s738_s10, %s1333_s2 }
  0xa4   :  { %p744_p9 = pnand %p742_p8, %p739_p7 }
  0xa6   :  { %747 = shalt.err (!%p744_p9)
}
  0xa7   :  { %530 = dma.vmem_to_hbm [thread:$0]  %s528_s6, 128, %s1333_s2, [#allocation4]  }
  0xa8   :  { %752 = dma.done.wait [#allocation4], 128  }
  0xa9   :  { %753 = vsyncadd [#allocation4], 4294967168 }
  0xaa   :  { %534 = vsyncpa [#allocation3], 1 }
  0xab   :  { %535 = vsyncpa [#allocation6], 1 }
  0xac   :  { %536 = vsyncpa [#allocation4], 1 }

</bundles_post_ra>
